<compile_context>
chip_gen: v7x
topology: tpu7x:2x2x1
jax: 0.10.0
libtpu: 0.0.40
codegen_flags: <defaults>
</compile_context>

<pallas_src>
import jax
import jax.numpy as jnp
from jax.experimental import pallas as pl
from jax.experimental.pallas import tpu as pltpu

EPS = 1e-5


def _stats_fused(v):
    """One-pass per-channel stats from a single fused reduce.

    v: (N, C, L). Stacks [v, v*v] along the sublane (channel) axis so mean and
    E[v^2] come out of one jnp.mean (one XLU reduce chain instead of two).
    Returns mean, biased var, each shaped (1, C, 1).
    """
    c = v.shape[1]
    stacked = jnp.concatenate([v, v * v], axis=1)            # (N, 2C, L)
    s = jnp.mean(stacked, axis=(0, 2), keepdims=True)        # (1, 2C, 1)
    mean = s[:, :c, :]
    mean_sq = s[:, c:, :]
    var = mean_sq - mean * mean
    return mean, var


def bn_chain_kernel(x_ref, o_ref):
    v = x_ref[...]                                           # (N, C, L) float32

    # ---- stage 1: v = bn2(x0)  (two-pass variance: raw input may be uncentered)
    mean = jnp.mean(v, axis=(0, 2), keepdims=True)
    centered = v - mean
    var = jnp.mean(centered * centered, axis=(0, 2), keepdims=True)
    v = centered * jax.lax.rsqrt(var + EPS)

    # ---- v = relu(v)
    v = jnp.maximum(v, 0.0)

    # ---- stages 2+3 folded: v = bn3(bn2(v))  (no ReLU in between)
    # bn(bn(y)) == (y - mu) * rsqrt(var + eps*(var + eps))   [exact identity]
    mean, var = _stats_fused(v)
    v = (v - mean) * jax.lax.rsqrt(var + EPS * (var + EPS))

    # ---- v = relu(v)
    v = jnp.maximum(v, 0.0)

    # ---- stage 4: v = bn2(v)
    mean, var = _stats_fused(v)
    v = (v - mean) * jax.lax.rsqrt(var + EPS)

    o_ref[...] = v


def model_forward(x_nchw):
    """x_nchw: (N, C, H, W) float32 -> (N, C, H, W) float32."""
    N, C, H, W = x_nchw.shape
    L = H * W

    # Free reshape (no transpose HLO for any N): (N, C, H, W) -> (N, C, H*W).
    x3d = x_nchw.reshape(N, C, L).astype(jnp.float32)

    vmem_spec = pl.BlockSpec(memory_space=pltpu.MemorySpace.VMEM)
    out3d = pl.pallas_call(
        bn_chain_kernel,
        out_shape=jax.ShapeDtypeStruct((N, C, L), jnp.float32),
        in_specs=[vmem_spec],
        out_specs=vmem_spec,
        input_output_aliases={0: 0},
    )(x3d)

    return out3d.reshape(N, C, H, W)


# ----------------------------- pure-JAX reference ---------------------------
def _ref_bn(v, axes):
    mean = jnp.mean(v, axis=axes, keepdims=True)
    var = jnp.mean((v - mean) ** 2, axis=axes, keepdims=True)
    return (v - mean) * jax.lax.rsqrt(var + EPS)


def reference_forward(x_nchw):
    axes = (0, 2, 3)
    v = _ref_bn(x_nchw, axes)        # bn2(x0)
    v = jnp.maximum(v, 0.0)          # relu
    v = _ref_bn(v, axes)             # bn2
    v = _ref_bn(v, axes)             # bn3 (chosen semantics, see TODO)
    v = jnp.maximum(v, 0.0)          # relu
    v = _ref_bn(v, axes)             # bn2
    return v


if __name__ == "__main__":
    key = jax.random.PRNGKey(0)
    x0 = jax.random.normal(key, (1, 16, 3, 3), dtype=jnp.float32)

    out = model_forward(x0)
    jax.block_until_ready(out)

    assert out.shape == (1, 16, 3, 3) and out.dtype == jnp.float32

    ref = reference_forward(x0)
    jax.block_until_ready(ref)
    max_err = float(jnp.max(jnp.abs(out - ref)))
    assert max_err < 1e-4, f"mismatch vs reference: max abs err {max_err}"

    print("KERNEL_OK")
</pallas_src>

<mosaic_0001>
module attributes {stable_mosaic.version = 11 : i64} {
  func.func @bn_chain_kernel(%arg0: memref<1x16x9xf32, #tpu.memory_space<vmem>>, %arg1: memref<1x16x9xf32, #tpu.memory_space<vmem>>) attributes {dimension_semantics = [], scalar_prefetch = 0 : i64, scratch_operands = 0 : i64, tpu.core_type = #tpu.core_type<tc>} {
    %c0 = arith.constant 0 : index
    %c0_0 = arith.constant 0 : index
    %c0_1 = arith.constant 0 : index
    %0 = vector.load %arg0[%c0, %c0_0, %c0_1] : memref<1x16x9xf32, #tpu.memory_space<vmem>>, vector<1x16x9xf32>
    %cst = arith.constant dense<0.000000e+00> : vector<16xf32>
    %1 = vector.multi_reduction <add>, %0, %cst [0, 2] : vector<1x16x9xf32> to vector<16xf32>
    %2 = vector.shape_cast %1 : vector<16xf32> to vector<1x16x1xf32>
    %cst_2 = arith.constant 9.000000e+00 : f32
    %3 = vector.broadcast %cst_2 : f32 to vector<1x16x1xf32>
    %4 = arith.divf %2, %3 : vector<1x16x1xf32>
    %5 = vector.broadcast %4 : vector<1x16x1xf32> to vector<1x16x9xf32>
    %6 = arith.subf %0, %5 : vector<1x16x9xf32>
    %7 = arith.mulf %6, %6 : vector<1x16x9xf32>
    %cst_3 = arith.constant dense<0.000000e+00> : vector<16xf32>
    %8 = vector.multi_reduction <add>, %7, %cst_3 [0, 2] : vector<1x16x9xf32> to vector<16xf32>
    %9 = vector.shape_cast %8 : vector<16xf32> to vector<1x16x1xf32>
    %cst_4 = arith.constant 9.000000e+00 : f32
    %10 = vector.broadcast %cst_4 : f32 to vector<1x16x1xf32>
    %11 = arith.divf %9, %10 : vector<1x16x1xf32>
    %cst_5 = arith.constant 9.99999974E-6 : f32
    %12 = vector.broadcast %cst_5 : f32 to vector<1x16x1xf32>
    %13 = arith.addf %11, %12 : vector<1x16x1xf32>
    %14 = math.rsqrt %13 : vector<1x16x1xf32>
    %15 = vector.broadcast %14 : vector<1x16x1xf32> to vector<1x16x9xf32>
    %16 = arith.mulf %6, %15 : vector<1x16x9xf32>
    %cst_6 = arith.constant 0.000000e+00 : f32
    %17 = vector.broadcast %cst_6 : f32 to vector<1x16x9xf32>
    %18 = arith.maximumf %16, %17 : vector<1x16x9xf32>
    %19 = arith.mulf %18, %18 : vector<1x16x9xf32>
    %20 = tpu.concatenate %18, %19 in 1 : vector<1x16x9xf32>, vector<1x16x9xf32> -> vector<1x32x9xf32>
    %cst_7 = arith.constant dense<0.000000e+00> : vector<32xf32>
    %21 = vector.multi_reduction <add>, %20, %cst_7 [0, 2] : vector<1x32x9xf32> to vector<32xf32>
    %22 = vector.shape_cast %21 : vector<32xf32> to vector<1x32x1xf32>
    %cst_8 = arith.constant 9.000000e+00 : f32
    %23 = vector.broadcast %cst_8 : f32 to vector<1x32x1xf32>
    %24 = arith.divf %22, %23 : vector<1x32x1xf32>
    %25 = vector.extract_strided_slice %24 {offsets = [0, 0, 0], sizes = [1, 16, 1], strides = [1, 1, 1]} : vector<1x32x1xf32> to vector<1x16x1xf32>
    %26 = vector.extract_strided_slice %24 {offsets = [0, 16, 0], sizes = [1, 16, 1], strides = [1, 1, 1]} : vector<1x32x1xf32> to vector<1x16x1xf32>
    %27 = arith.mulf %25, %25 : vector<1x16x1xf32>
    %28 = arith.subf %26, %27 : vector<1x16x1xf32>
    %29 = vector.broadcast %25 : vector<1x16x1xf32> to vector<1x16x9xf32>
    %30 = arith.subf %18, %29 : vector<1x16x9xf32>
    %cst_9 = arith.constant 9.99999974E-6 : f32
    %31 = vector.broadcast %cst_9 : f32 to vector<1x16x1xf32>
    %32 = arith.addf %28, %31 : vector<1x16x1xf32>
    %cst_10 = arith.constant 9.99999974E-6 : f32
    %33 = vector.broadcast %cst_10 : f32 to vector<1x16x1xf32>
    %34 = arith.mulf %33, %32 : vector<1x16x1xf32>
    %35 = arith.addf %28, %34 : vector<1x16x1xf32>
    %36 = math.rsqrt %35 : vector<1x16x1xf32>
    %37 = vector.broadcast %36 : vector<1x16x1xf32> to vector<1x16x9xf32>
    %38 = arith.mulf %30, %37 : vector<1x16x9xf32>
    %cst_11 = arith.constant 0.000000e+00 : f32
    %39 = vector.broadcast %cst_11 : f32 to vector<1x16x9xf32>
    %40 = arith.maximumf %38, %39 : vector<1x16x9xf32>
    %41 = arith.mulf %40, %40 : vector<1x16x9xf32>
    %42 = tpu.concatenate %40, %41 in 1 : vector<1x16x9xf32>, vector<1x16x9xf32> -> vector<1x32x9xf32>
    %cst_12 = arith.constant dense<0.000000e+00> : vector<32xf32>
    %43 = vector.multi_reduction <add>, %42, %cst_12 [0, 2] : vector<1x32x9xf32> to vector<32xf32>
    %44 = vector.shape_cast %43 : vector<32xf32> to vector<1x32x1xf32>
    %cst_13 = arith.constant 9.000000e+00 : f32
    %45 = vector.broadcast %cst_13 : f32 to vector<1x32x1xf32>
    %46 = arith.divf %44, %45 : vector<1x32x1xf32>
    %47 = vector.extract_strided_slice %46 {offsets = [0, 0, 0], sizes = [1, 16, 1], strides = [1, 1, 1]} : vector<1x32x1xf32> to vector<1x16x1xf32>
    %48 = vector.extract_strided_slice %46 {offsets = [0, 16, 0], sizes = [1, 16, 1], strides = [1, 1, 1]} : vector<1x32x1xf32> to vector<1x16x1xf32>
    %49 = arith.mulf %47, %47 : vector<1x16x1xf32>
    %50 = arith.subf %48, %49 : vector<1x16x1xf32>
    %51 = vector.broadcast %47 : vector<1x16x1xf32> to vector<1x16x9xf32>
    %52 = arith.subf %40, %51 : vector<1x16x9xf32>
    %cst_14 = arith.constant 9.99999974E-6 : f32
    %53 = vector.broadcast %cst_14 : f32 to vector<1x16x1xf32>
    %54 = arith.addf %50, %53 : vector<1x16x1xf32>
    %55 = math.rsqrt %54 : vector<1x16x1xf32>
    %56 = vector.broadcast %55 : vector<1x16x1xf32> to vector<1x16x9xf32>
    %57 = arith.mulf %52, %56 : vector<1x16x9xf32>
    %c0_15 = arith.constant 0 : index
    %c0_16 = arith.constant 0 : index
    %c0_17 = arith.constant 0 : index
    %58 = vector.load %arg1[%c0_15, %c0_16, %c0_17] : memref<1x16x9xf32, #tpu.memory_space<vmem>>, vector<1x16x9xf32>
    tpu.vector_store %arg1[%c0_15, %c0_16, %c0_17], %57 {strides = array<i32>} : memref<1x16x9xf32, #tpu.memory_space<vmem>>, vector<1x16x9xf32>,
    return
  }
}

</mosaic_0001>

<bundles_post_ra>
// kernel: tpu_custom_call.1
= control target key start
LH: loop header
LB: loop body
LE: loop exit
PB: predicated region body
PF: predicated region fallthrough
CT: control target
= control target key end

     0   :  { %vm10_vm0 = vcmask 72704   ;;  %s160_s0 = inlined_call_operand.vmem [shape: f32[1,16,9], index: 0, kind: input, shape index: {}, may-alias: {0,1}]   ;;  %s161_s1 = inlined_call_operand.vmem [shape: f32[1,16,9], index: 1, kind: output, shape index: {}, may-alias: {0,1}]  }
   0x1   :  { %v8_v0 = vld [vmem:[%s160_s0] sm:$0xff]  ;;  %v9_v1 = vld [vmem:[%s160_s0 + $0x8] sm:$0xff] }
   0x2   :  { %v11_v2 = vsel %vm10_vm0, %v8_v0, 0.0  ;;  %v14_v3 = vsel %vm10_vm0, %v9_v1, 0.0 }
   0x3   :  { %12 = vadd.xlane.f32.xlu0 %v11_v2 }
   0x7   :  { %15 = vadd.xlane.f32.xlu0 %v14_v3 }
  0x90   :  { %v13_v4 = vpop.xlane.xlu0 %12 }
  0x91   :  { %v18_v5 = vmul.f32 0.11111111, %v13_v4 }
  0x93   :  { %v20_v6 = vsub.f32 %v8_v0, %v18_v5 }
  0x94   :  { %v16_v7 = vpop.xlane.xlu0 %15 }
  0x95   :  { %v19_v8 = vmul.f32 0.11111111, %v16_v7  ;;  %v22_v9 = vmul.f32 %v20_v6, %v20_v6 }
  0x97   :  { %v21_v10 = vsub.f32 %v9_v1, %v19_v8  ;;  %v24_v11 = vsel %vm10_vm0, %v22_v9, 0.0 }
  0x98   :  { %25 = vadd.xlane.f32.xlu1 %v24_v11 }
  0x99   :  { %v23_v12 = vmul.f32 %v21_v10, %v21_v10 }
  0x9b   :  { %v27_v13 = vsel %vm10_vm0, %v23_v12, 0.0 }
  0x9c   :  { %28 = vadd.xlane.f32.xlu1 %v27_v13 }
 0x125   :  { %v26_v14 = vpop.xlane.xlu1 %25 }
 0x126   :  { %v30_v15 = vmul.f32 0.11111111, %v26_v14 }
 0x128   :  { %v32_v16 = vadd.f32 1e-05, %v30_v15 }
 0x129   :  { %v29_v17 = vpop.xlane.xlu1 %28 }
 0x12a   :  { %112 = vrsqrt.f32 %v32_v16  ;;  %v31_v18 = vmul.f32 0.11111111, %v29_v17 }
 0x12c   :  { %v33_v19 = vadd.f32 1e-05, %v31_v18 }
 0x12e   :  { %114 = vrsqrt.f32 %v33_v19 }
 0x134   :  { %v113_v20 = vpop.eup %112 }
 0x135   :  { %v36_v21 = vmul.f32 %v113_v20, %v20_v6 }
 0x137   :  { %v38_v22 = vmax.f32 %v36_v21, 0.0 }
 0x138   :  { %v115_v23 = vpop.eup %114 }
 0x139   :  { %v42_v24 = vsel %vm10_vm0, %v38_v22, 0.0  ;;  %v40_v25 = vmul.f32 %v38_v22, %v38_v22  ;;  %v37_v26 = vmul.f32 %v115_v23, %v21_v10 }
 0x13a   :  { %43 = vadd.xlane.f32.xlu0 %v42_v24 }
 0x13b   :  { %v39_v27 = vmax.f32 %v37_v26, 0.0  ;;  %v48_v28 = vsel %vm10_vm0, %v40_v25, 0.0 }
 0x13d   :  { %v45_v29 = vsel %vm10_vm0, %v39_v27, 0.0  ;;  %v41_v30 = vmul.f32 %v39_v27, %v39_v27 }
 0x13e   :  { %49 = vadd.xlane.f32.xlu0 %v48_v28  ;;  %46 = vadd.xlane.f32.xlu1 %v45_v29 }
 0x13f   :  { %v51_v31 = vsel %vm10_vm0, %v41_v30, 0.0 }
 0x142   :  { %52 = vadd.xlane.f32.xlu1 %v51_v31 }
 0x1c7   :  { %v44_v32 = vpop.xlane.xlu0 %43 }
 0x1c8   :  { %v54_v33 = vmul.f32 0.11111111, %v44_v32 }
 0x1ca   :  { %v58_v36 = vmul.f32 %v54_v33, %v54_v33  ;;  %v62_v50 = vsub.f32 %v38_v22, %v54_v33 }
 0x1cb   :  { %v47_v34 = vpop.xlane.xlu1 %46  ;;  %v50_v35 = vpop.xlane.xlu0 %49 }
 0x1cc   :  { %v55_v37 = vmul.f32 0.11111111, %v47_v34  ;;  %v56_v38 = vmul.f32 0.11111111, %v50_v35 }
 0x1ce   :  { %v60_v39 = vsub.f32 %v56_v38, %v58_v36  ;;  %v59_v41 = vmul.f32 %v55_v37, %v55_v37  ;;  %v63_v53 = vsub.f32 %v39_v27, %v55_v37 }
 0x1cf   :  { %v53_v40 = vpop.xlane.xlu1 %52 }
 0x1d0   :  { %v64_v42 = vadd.f32 1e-05, %v60_v39  ;;  %v57_v43 = vmul.f32 0.11111111, %v53_v40 }
 0x1d2   :  { %v66_v44 = vmul.f32 1e-05, %v64_v42  ;;  %v61_v45 = vsub.f32 %v57_v43, %v59_v41 }
 0x1d4   :  { %v68_v46 = vadd.f32 %v66_v44, %v60_v39  ;;  %v65_v47 = vadd.f32 1e-05, %v61_v45 }
 0x1d6   :  { %116 = vrsqrt.f32 %v68_v46  ;;  %v67_v48 = vmul.f32 1e-05, %v65_v47 }
 0x1d8   :  { %v69_v49 = vadd.f32 %v67_v48, %v61_v45 }
 0x1da   :  { %118 = vrsqrt.f32 %v69_v49 }
 0x1e0   :  { %v117_v51 = vpop.eup %116 }
 0x1e1   :  { %v72_v52 = vmul.f32 %v117_v51, %v62_v50 }
 0x1e3   :  { %v74_v54 = vmax.f32 %v72_v52, 0.0 }
 0x1e4   :  { %v119_v55 = vpop.eup %118 }
 0x1e5   :  { %v78_v56 = vsel %vm10_vm0, %v74_v54, 0.0  ;;  %v73_v57 = vmul.f32 %v119_v55, %v63_v53  ;;  %v76_v58 = vmul.f32 %v74_v54, %v74_v54 }
 0x1e6   :  { %79 = vadd.xlane.f32.xlu0 %v78_v56 }
 0x1e7   :  { %v75_v59 = vmax.f32 %v73_v57, 0.0  ;;  %v84_v61 = vsel %vm10_vm0, %v76_v58, 0.0 }
 0x1e9   :  { %v81_v60 = vsel %vm10_vm0, %v75_v59, 0.0  ;;  %v77_v62 = vmul.f32 %v75_v59, %v75_v59 }
 0x1ea   :  { %82 = vadd.xlane.f32.xlu1 %v81_v60  ;;  %85 = vadd.xlane.f32.xlu0 %v84_v61 }
 0x1eb   :  { %v87_v63 = vsel %vm10_vm0, %v77_v62, 0.0 }
 0x1ee   :  { %88 = vadd.xlane.f32.xlu1 %v87_v63 }
 0x273   :  { %v80_v0 = vpop.xlane.xlu0 %79 }
 0x274   :  { %v90_v1 = vmul.f32 0.11111111, %v80_v0 }
 0x276   :  { %v94_v4 = vmul.f32 %v90_v1, %v90_v1  ;;  %v98_v14 = vsub.f32 %v74_v54, %v90_v1 }
 0x277   :  { %v83_v2 = vpop.xlane.xlu1 %82  ;;  %v86_v3 = vpop.xlane.xlu0 %85 }
 0x278   :  { %v91_v5 = vmul.f32 0.11111111, %v83_v2  ;;  %v92_v6 = vmul.f32 0.11111111, %v86_v3 }
 0x27a   :  { %v96_v7 = vsub.f32 %v92_v6, %v94_v4  ;;  %v95_v9 = vmul.f32 %v91_v5, %v91_v5  ;;  %v99_v17 = vsub.f32 %v75_v59, %v91_v5 }
 0x27b   :  { %v89_v8 = vpop.xlane.xlu1 %88 }
 0x27c   :  { %v100_v10 = vadd.f32 1e-05, %v96_v7  ;;  %v93_v11 = vmul.f32 0.11111111, %v89_v8 }
 0x27e   :  { %120 = vrsqrt.f32 %v100_v10  ;;  %v97_v12 = vsub.f32 %v93_v11, %v95_v9 }
 0x280   :  { %v101_v13 = vadd.f32 1e-05, %v97_v12 }
 0x282   :  { %122 = vrsqrt.f32 %v101_v13 }
 0x288   :  { %v121_v15 = vpop.eup %120 }
 0x289   :  { %v104_v16 = vmul.f32 %v121_v15, %v98_v14 }
 0x28b   :  { %106 = vst.msk [vmem:[%s161_s1] sm:$0xff] %vm10_vm0, %v104_v16 }
 0x28c   :  { %v123_v18 = vpop.eup %122 }
 0x28d   :  { %v105_v19 = vmul.f32 %v123_v18, %v99_v17 }
 0x28f   :  { %107 = vst.msk [vmem:[%s161_s1 + $0x8] sm:$0xff] %vm10_vm0, %v105_v19 }

</bundles_post_ra>
